<compile_context>
chip_gen: v7x
topology: tpu7x:2x2x1
jax: 0.10.0
libtpu: 0.0.40
codegen_flags: <defaults>
</compile_context>

<pallas_src>
import functools
import math

import numpy as np
import jax
import jax.numpy as jnp
from jax.experimental import pallas as pl
from jax.experimental.pallas import tpu as pltpu


def _round_up(a, m):
    return ((a + m - 1) // m) * m


def tagging_kernel(x_ref, wcat_ref, bconv_ref, pwh_ref, bhead_ref, out_ref, *, valid_h):
    # x_ref    : (B, Hp, K=3*(W+2)*Cin)  bf16 im2col rows (dy folded by the wrapper)
    # wcat_ref : (K, W*Cout)             bf16 block-Toeplitz conv weight
    # bconv_ref: (1, W*Cout)             f32 conv bias tiled over w
    # pwh_ref  : (W*Cout, TP)            bf16 (GAP over w + head)/(H*W), zero-padded to TP
    # bhead_ref: (1, TP)                 f32 head bias zero-padded to TP lanes
    # out_ref  : (B, TP)                 f32 lane-dense logits slab
    B, Hp, K = x_ref.shape
    WCout = wcat_ref.shape[-1]

    # 3x3 conv as ONE lane-dense bf16 MXU matmul, f32 accumulation.
    # (B, Hp, K) -> (B*Hp, K) is a free relabel because Hp is a multiple of the bf16
    # sublane tile (16).
    rows = x_ref[...].reshape(B * Hp, K)
    acc = jnp.dot(rows, wcat_ref[...], preferred_element_type=jnp.float32)   # (B*Hp, WCout)

    # Bias + ReLU in f32; reuse the accumulator so only one big temporary stays live.
    acc = jnp.maximum(acc + bconv_ref[...], 0.0)

    feats = acc.reshape(B, Hp, WCout)
    if valid_h < Hp:
        # Padded h rows would contribute ReLU(bconv) to the pool -> zero them out.
        hidx = jax.lax.broadcasted_iota(jnp.int32, (B, Hp, WCout), 1)
        feats = jnp.where(hidx < valid_h, feats, 0.0)

    # Pool over h BEFORE the head matmul (exact: ReLU is per-position, pool/head are
    # linear), shrinking the second matmul from (B*Hp, WCout) to (B, WCout).
    pooled = feats.sum(axis=1)                                               # (B, WCout) f32

    # GAP over w + channel reduce + head weight in one small bf16 MXU matmul
    # (1/(H*W) already folded into pwh by the wrapper).
    z = jnp.dot(pooled.astype(jnp.bfloat16), pwh_ref[...],
                preferred_element_type=jnp.float32)                          # (B, TP)
    out_ref[...] = (z + bhead_ref[...]).astype(out_ref.dtype)


def tagging_forward(x_nchw, wconv, bconv, whead, bhead, *, max_block_images=128):
    """x_nchw: (N, Cin, H, W) float32. Returns logits (N, num_tags)."""
    N, Cin, H, W = x_nchw.shape
    Cout = wconv.shape[0]
    T = whead.shape[0]
    TP = 128                                    # lane-dense padded tag width
    KH = KW = 3

    # Image block per grid step: multiple of 8 sublanes; split the batch into >=2 steps
    # when it allows, so v7x's two TensorCores both get grid steps; capped at 128 so the
    # per-step working set (~10 MiB) stays comfortably inside v7x's 64 MiB VMEM.
    B = min(max_block_images, max(8, _round_up(math.ceil(N / 2), 8)))
    n_steps = math.ceil(N / B)
    Npad = n_steps * B

    Hp = _round_up(H, 16)                       # bf16 sublane tile -> free in-kernel relabel
    K = KH * (W + 2) * Cin                      # 216 for the default instantiation
    WCout = W * Cout

    # ---- input prep: NCHW -> zero-padded NHWC, fold the dy (kernel-row) axis into lanes ----
    # TODO(synk): ideally the producer emits this padded bf16 layout directly (or XLA fuses
    # it via allow_input_fusion); done here it costs one extra HBM round trip of x.
    x = jnp.transpose(x_nchw, (0, 2, 3, 1)).astype(jnp.float32)             # (N, H, W, Cin)
    x = jnp.pad(x, ((0, Npad - N), (1, 1), (1, 1), (0, 0)))                 # (Npad, H+2, W+2, Cin)
    xrows = jnp.stack([x[:, dy:dy + H] for dy in range(KH)], axis=2)        # (Npad, H, 3, W+2, Cin)
    xrows = jnp.pad(xrows, ((0, 0), (0, Hp - H), (0, 0), (0, 0), (0, 0)))
    x_in = xrows.reshape(Npad, Hp, K).astype(jnp.bfloat16)

    # ---- conv weight as ONE block-Toeplitz matrix:
    #      wcat[dy*(W+2)*Cin + iw*Cin + ci, w*Cout + co] = K[dy, iw-w, ci, co] (0 <= iw-w < 3)
    wk = jnp.transpose(wconv, (2, 3, 1, 0)).astype(jnp.float32)             # (3, 3, Cin, Cout)
    msel = np.zeros((KW, W + 2, W), np.float32)
    for dx in range(KW):
        msel[dx, dx:dx + W, :] = np.eye(W, dtype=np.float32)
    wt = jnp.einsum('dpw,ydio->ypiwo', jnp.asarray(msel), wk)               # (3, W+2, Cin, W, Cout)
    wcat = wt.reshape(K, WCout).astype(jnp.bfloat16)

    bconv_tile = jnp.tile(bconv.astype(jnp.float32).reshape(1, Cout), (1, W))    # (1, W*Cout)

    # GAP (mean over h,w) + head folded: pwh[w*Cout+ci, t] = whead[t, ci] / (H*W)
    pwh = jnp.tile(whead.astype(jnp.float32).T / float(H * W), (W, 1))           # (W*Cout, T)
    pwh = jnp.pad(pwh, ((0, 0), (0, TP - T))).astype(jnp.bfloat16)
    bhead_pad = jnp.pad(bhead.astype(jnp.float32).reshape(1, T), ((0, 0), (0, TP - T)))

    kernel = functools.partial(tagging_kernel, valid_h=H)

    out = pl.pallas_call(
        kernel,
        out_shape=jax.ShapeDtypeStruct((Npad, TP), jnp.float32),
        grid_spec=pltpu.PrefetchScalarGridSpec(
            num_scalar_prefetch=0,
            grid=(n_steps,),
            in_specs=[
                pl.BlockSpec((B, Hp, K), lambda n: (n, 0, 0)),
                pl.BlockSpec((K, WCout), lambda n: (0, 0)),
                pl.BlockSpec((1, WCout), lambda n: (0, 0)),
                pl.BlockSpec((WCout, TP), lambda n: (0, 0)),
                pl.BlockSpec((1, TP), lambda n: (0, 0)),
            ],
            out_specs=pl.BlockSpec((B, TP), lambda n: (n, 0)),
        ),
        compiler_params=pltpu.CompilerParams(
            dimension_semantics=("parallel",),
            # ~10 MiB peak per step at B=128 (4 MiB f32 accumulator + double-buffered
            # bf16 x block + resident weights); 40 MiB gives headroom on v5e/v6e while
            # staying within v7x's tighter 64 MiB-per-core budget.
            vmem_limit_bytes=40 * 1024 * 1024,
        ),
    )(x_in, wcat, bconv_tile, pwh, bhead_pad)
    return out[:N, :T]


def reference_forward(x_nchw, wconv, bconv, whead, bhead):
    """Pure-JAX reference (conv + relu + GAP + linear head)."""
    y = jax.lax.conv_general_dilated(
        x_nchw, wconv, window_strides=(1, 1), padding="SAME",
        dimension_numbers=("NCHW", "OIHW", "NCHW"))
    y = jnp.maximum(y + bconv[None, :, None, None], 0.0)
    pooled = jnp.mean(y, axis=(2, 3))                                        # (N, Cout)
    return pooled @ whead.T + bhead[None, :]


# TODO(synk): store_progress (torch.save of the head state dict) is host-side I/O with
# no Pallas equivalent; only the forward pass is implemented.

if __name__ == "__main__":
    N, Cin, H, W = 2, 4, 16, 16
    Cout, T = 32, 8

    key = jax.random.PRNGKey(0)
    k1, k2, k3, k4, k5 = jax.random.split(key, 5)
    x = jax.random.normal(k1, (N, Cin, H, W), jnp.float32)
    wconv = jax.random.normal(k2, (Cout, Cin, 3, 3), jnp.float32) * 0.1
    bconv = jax.random.normal(k3, (Cout,), jnp.float32) * 0.1
    whead = jax.random.normal(k4, (T, Cout), jnp.float32) * 0.1
    bhead = jax.random.normal(k5, (T,), jnp.float32) * 0.1

    out = tagging_forward(x, wconv, bconv, whead, bhead)
    jax.block_until_ready(out)

    ref = reference_forward(x, wconv, bconv, whead, bhead)
    assert out.shape == (N, T)
    # bf16 MXU operands with f32 accumulation -> looser tolerance than the pure-f32 version.
    assert jnp.allclose(out, ref, atol=2e-2, rtol=2e-2), "mismatch vs JAX reference"

    print("KERNEL_OK")
</pallas_src>

<mosaic_0001>
module attributes {stable_mosaic.version = 11 : i64} {
  func.func @tagging_kernel(%arg0: i32, %arg1: memref<8x16x216xbf16, #tpu.memory_space<vmem>>, %arg2: memref<216x512xbf16, #tpu.memory_space<vmem>>, %arg3: memref<1x512xf32, #tpu.memory_space<vmem>>, %arg4: memref<512x128xbf16, #tpu.memory_space<vmem>>, %arg5: memref<1x128xf32, #tpu.memory_space<vmem>>, %arg6: memref<8x128xf32, #tpu.memory_space<vmem>>) attributes {dimension_semantics = [#tpu.dimension_semantics<parallel>], iteration_bounds = array<i64: 1>, scalar_prefetch = 0 : i64, scratch_operands = 0 : i64, tpu.core_type = #tpu.core_type<tc>, window_params = [{transform_indices = @transform_0, window_bounds = array<i64: 8, 16, 216>}, {pipeline_mode = #tpu.pipeline_mode<synchronous>, transform_indices = @transform_1, window_bounds = array<i64: 216, 512>}, {pipeline_mode = #tpu.pipeline_mode<synchronous>, transform_indices = @transform_2, window_bounds = array<i64: 1, 512>}, {pipeline_mode = #tpu.pipeline_mode<synchronous>, transform_indices = @transform_3, window_bounds = array<i64: 512, 128>}, {pipeline_mode = #tpu.pipeline_mode<synchronous>, transform_indices = @transform_4, window_bounds = array<i64: 1, 128>}, {transform_indices = @transform_5, window_bounds = array<i64: 8, 128>}]} {
    %c0 = arith.constant 0 : index
    %c0_0 = arith.constant 0 : index
    %c0_1 = arith.constant 0 : index
    %0 = vector.load %arg1[%c0, %c0_0, %c0_1] : memref<8x16x216xbf16, #tpu.memory_space<vmem>>, vector<8x16x216xbf16>
    %1 = vector.shape_cast %0 : vector<8x16x216xbf16> to vector<128x216xbf16>
    %c0_2 = arith.constant 0 : index
    %c0_3 = arith.constant 0 : index
    %2 = vector.load %arg2[%c0_2, %c0_3] : memref<216x512xbf16, #tpu.memory_space<vmem>>, vector<216x512xbf16>
    %cst = arith.constant dense<0.000000e+00> : vector<128x512xf32>
    %3 = tpu.matmul %1, %2, %cst {dimension_numbers = #tpu.dot_dimension_numbers<[1], [0], [0], [1], [0, 0, 1, 1], [], []>} : vector<128x216xbf16>, vector<216x512xbf16>, vector<128x512xf32> -> vector<128x512xf32>
    %c0_4 = arith.constant 0 : index
    %c0_5 = arith.constant 0 : index
    %4 = vector.load %arg3[%c0_4, %c0_5] : memref<1x512xf32, #tpu.memory_space<vmem>>, vector<1x512xf32>
    %5 = vector.broadcast %4 : vector<1x512xf32> to vector<128x512xf32>
    %6 = arith.addf %3, %5 : vector<128x512xf32>
    %cst_6 = arith.constant 0.000000e+00 : f32
    %7 = vector.broadcast %cst_6 : f32 to vector<128x512xf32>
    %8 = arith.maximumf %6, %7 : vector<128x512xf32>
    %9 = vector.shape_cast %8 : vector<128x512xf32> to vector<8x16x512xf32>
    %cst_7 = arith.constant dense<0.000000e+00> : vector<8x512xf32>
    %10 = vector.multi_reduction <add>, %9, %cst_7 [1] : vector<8x16x512xf32> to vector<8x512xf32>
    %11 = arith.truncf %10 : vector<8x512xf32> to vector<8x512xbf16>
    %c0_8 = arith.constant 0 : index
    %c0_9 = arith.constant 0 : index
    %12 = vector.load %arg4[%c0_8, %c0_9] : memref<512x128xbf16, #tpu.memory_space<vmem>>, vector<512x128xbf16>
    %cst_10 = arith.constant dense<0.000000e+00> : vector<8x128xf32>
    %13 = tpu.matmul %11, %12, %cst_10 {dimension_numbers = #tpu.dot_dimension_numbers<[1], [0], [0], [1], [0, 0, 1, 1], [], []>} : vector<8x512xbf16>, vector<512x128xbf16>, vector<8x128xf32> -> vector<8x128xf32>
    %c0_11 = arith.constant 0 : index
    %c0_12 = arith.constant 0 : index
    %14 = vector.load %arg5[%c0_11, %c0_12] : memref<1x128xf32, #tpu.memory_space<vmem>>, vector<1x128xf32>
    %15 = vector.broadcast %14 : vector<1x128xf32> to vector<8x128xf32>
    %16 = arith.addf %13, %15 : vector<8x128xf32>
    %c0_13 = arith.constant 0 : index
    %c0_14 = arith.constant 0 : index
    %17 = vector.load %arg6[%c0_13, %c0_14] : memref<8x128xf32, #tpu.memory_space<vmem>>, vector<8x128xf32>
    tpu.vector_store %arg6[%c0_13, %c0_14], %16 {strides = array<i32>} : memref<8x128xf32, #tpu.memory_space<vmem>>, vector<8x128xf32>,
    return
  }
  func.func @transform_0(%arg0: i32) -> (i32, i32, i32) {
    %c0_i32 = arith.constant 0 : i32
    %c0_i32_0 = arith.constant 0 : i32
    %c0_i32_1 = arith.constant 0 : i32
    return %arg0, %c0_i32, %c0_i32_0 : i32, i32, i32
  }
  func.func @transform_1(%arg0: i32) -> (i32, i32) {
    %c0_i32 = arith.constant 0 : i32
    %c0_i32_0 = arith.constant 0 : i32
    %c0_i32_1 = arith.constant 0 : i32
    return %c0_i32, %c0_i32_0 : i32, i32
  }
  func.func @transform_2(%arg0: i32) -> (i32, i32) {
    %c0_i32 = arith.constant 0 : i32
    %c0_i32_0 = arith.constant 0 : i32
    %c0_i32_1 = arith.constant 0 : i32
    return %c0_i32, %c0_i32_0 : i32, i32
  }
  func.func @transform_3(%arg0: i32) -> (i32, i32) {
    %c0_i32 = arith.constant 0 : i32
    %c0_i32_0 = arith.constant 0 : i32
    %c0_i32_1 = arith.constant 0 : i32
    return %c0_i32, %c0_i32_0 : i32, i32
  }
  func.func @transform_4(%arg0: i32) -> (i32, i32) {
    %c0_i32 = arith.constant 0 : i32
    %c0_i32_0 = arith.constant 0 : i32
    %c0_i32_1 = arith.constant 0 : i32
    return %c0_i32, %c0_i32_0 : i32, i32
  }
  func.func @transform_5(%arg0: i32) -> (i32, i32) {
    %c0_i32 = arith.constant 0 : i32
    %c0_i32_0 = arith.constant 0 : i32
    return %arg0, %c0_i32 : i32, i32
  }
}

</mosaic_0001>

<bundles_post_ra>
// kernel: tpu_custom_call.1
= control target key start
LH: loop header
LB: loop body
LE: loop exit
PB: predicated region body
PF: predicated region fallthrough
CT: control target
= control target key end

     0   :  { %10 = vsyncpa [#allocation3], 0  ;;  %s2353_s0 = inlined_call_operand.hbm [shape: bf16[8,16,216], index: 0, kind: input, shape index: {}]   ;;  %s2354_s1 = inlined_call_operand.hbm [shape: bf16[216,512], index: 1, kind: input, shape index: {}]   ;;  %s2355_s2 = inlined_call_operand.vmem [shape: f32[1,512], index: 2, kind: input, shape index: {}]   ;;  %s2356_s3 = inlined_call_operand.hbm [shape: bf16[512,128], index: 3, kind: input, shape index: {}]   ;;  %s2357_s4 = inlined_call_operand.vmem [shape: f32[1,128], index: 4, kind: input, shape index: {}]   ;;  %s2358_s5 = inlined_call_operand.hbm [shape: f32[8,128], index: 5, kind: output, shape index: {}]  }
   0x1   :  { %11 = vsyncpa [#allocation6], 0 }
   0x2   :  { %12 = vsyncpa [#allocation4], 0  ;;  %s1957_s18 = smov [#allocation5]   ;;  %s1863_s22 = scalar_lea.hbm %s2354_s1, 6912 }
   0x3   :  { %s30_s19 = sshll.u32 %s1957_s18, 4  ;;  %p1864_p0 = scmp.ne.s32.totalorder %s2354_s1, %s1863_s22  ;;  %s31_s19 = int_to_ptr.vmem [resolvable:$true] %s30_s19 }
   0x4   :  { %p1867_p1 = scmp.lt.u32.totalorder %s1863_s22, %s2354_s1 }
   0x6   :  { %p1869_p2 = pnand %p1867_p1, %p1864_p0 }
   0x8   :  { %1872 = shalt.err (!%p1869_p2)
}
   0x9   :  { %s1873_s27 = scalar_lea.vmem %s31_s19, 6912  ;;  %p1878_p4 = scmp.lt.s32.totalorder %s31_s19, %s31_s19 }
   0xa   :  { %p1874_p3 = scmp.ne.s32.totalorder %s31_s19, %s1873_s27  ;;  %p1879_p5 = scmp.lt.s32.totalorder %s1873_s27, %s1873_s27 }
   0xc   :  { %p1880_p6 = por %p1879_p5, %p1878_p4 }
   0xe   :  { %p1881_p7 = pnand %p1880_p6, %p1874_p3 }
  0x10   :  { %1884 = shalt.err (!%p1881_p7)
}
  0x11   :  { %s1958_s28 = smov 256   ;;  %s1959_s29 = smov 16  }
  0x12   :  { %36 = dma.hbm_to_vmem [thread:$0]  %s2354_s1, 6912, %s31_s19, [#allocation6], %s1958_s28, %s1958_s28, %s1959_s29  }
  0x13   :  { %s1960_s7 = smov [#allocation2]   ;;  %s1885_s11 = scalar_lea.hbm %s2353_s0, 2048 }
  0x14   :  { %s18_s8 = sshll.u32 %s1960_s7, 4  ;;  %p1886_p8 = scmp.ne.s32.totalorder %s2353_s0, %s1885_s11  ;;  %s19_s8 = int_to_ptr.vmem [resolvable:$true] %s18_s8 }
  0x15   :  { %p1889_p9 = scmp.lt.u32.totalorder %s1885_s11, %s2353_s0 }
  0x17   :  { %p1891_p10 = pnand %p1889_p9, %p1886_p8 }
  0x19   :  { %1894 = shalt.err (!%p1891_p10)
}
  0x1a   :  { %s1895_s16 = scalar_lea.vmem %s19_s8, 2048  ;;  %p1900_p12 = scmp.lt.s32.totalorder %s19_s8, %s19_s8 }
  0x1b   :  { %p1896_p11 = scmp.ne.s32.totalorder %s19_s8, %s1895_s16  ;;  %p1901_p13 = scmp.lt.s32.totalorder %s1895_s16, %s1895_s16 }
  0x1d   :  { %p1902_p0 = por %p1901_p13, %p1900_p12 }
  0x1f   :  { %p1903_p1 = pnand %p1902_p0, %p1896_p11 }
  0x21   :  { %1906 = shalt.err (!%p1903_p1)
}
  0x22   :  { %s1961_s1 = smov 128   ;;  %s1962_s17 = smov 8  }
  0x23   :  { %24 = dma.hbm_to_vmem [thread:$0]  %s2353_s0, 2048, %s19_s8, [#allocation3], %s1961_s1, %s1961_s1, %s1962_s17  }
  0x24   :  { %s1963_s20 = smov [#allocation7]   ;;  %s1907_s24 = scalar_lea.hbm %s2356_s3, 4096 }
  0x25   :  { %s44_s21 = sshll.u32 %s1963_s20, 4  ;;  %p1908_p2 = scmp.ne.s32.totalorder %s2356_s3, %s1907_s24  ;;  %s45_s21 = int_to_ptr.vmem [resolvable:$true] %s44_s21 }
  0x26   :  { %p1911_p3 = scmp.lt.u32.totalorder %s1907_s24, %s2356_s3 }
  0x28   :  { %p1913_p4 = pnand %p1911_p3, %p1908_p2 }
  0x2a   :  { %1916 = shalt.err (!%p1913_p4)
}
  0x2b   :  { %s1917_s29 = scalar_lea.vmem %s45_s21, 4096  ;;  %p1922_p6 = scmp.lt.s32.totalorder %s45_s21, %s45_s21 }
  0x2c   :  { %p1918_p5 = scmp.ne.s32.totalorder %s45_s21, %s1917_s29  ;;  %p1923_p7 = scmp.lt.s32.totalorder %s1917_s29, %s1917_s29 }
  0x2e   :  { %p1924_p8 = por %p1923_p7, %p1922_p6 }
  0x30   :  { %p1925_p9 = pnand %p1924_p8, %p1918_p5 }
  0x32   :  { %1928 = shalt.err (!%p1925_p9)
}
  0x33   :  { %s1964_s0 = smov 64   ;;  %s1965_s30 = smov 4  }
  0x34   :  { %50 = dma.hbm_to_vmem [thread:$0]  %s2356_s3, 4096, %s45_s21, [#allocation6], %s1964_s0, %s1964_s0, %s1965_s30  }
  0x35   :  { %1951 = dma.done.wait [#allocation3], 2048  }
  0x36   :  { %1952 = vsyncadd [#allocation3], 4294965248 }
  0x37   :  { %1953 = dma.done.wait [#allocation6], 11008  }
  0x38   :  { %1954 = vsyncadd [#allocation6], 4294956288  ;;  %v1725_v0 = vld [vmem:[#allocation5 + $0x4] ss:$16 sps:$4 sm:$0xff]   ;;  %v1727_v1 = vld [vmem:[#allocation5 + $0xc] ss:$16 sps:$4 sm:$0xff]  }
  0x39   :  { %535 = vmatprep.subr.bf16.mxu0 %v1725_v0  ;;  %v1729_v2 = vld [vmem:[#allocation5] ss:$16 sps:$4 sm:$0xff]   ;;  %v1730_v3 = vld [vmem:[#allocation5 + $0x8] ss:$16 sps:$4 sm:$0xff]   ;;  %648 = vmatprep.subr.bf16.mxu1 %v1727_v1  ;;  %v1731_v4 = vld [vmem:[#allocation5 + $0x24] ss:$16 sps:$4 sm:$0xff]  }
  0x3a   :  { %536 = vmatpush1.bf16.msra.mxu0 %v1729_v2  ;;  %649 = vmatpush1.bf16.msra.mxu1 %v1730_v3  ;;  %v1733_v5 = vld [vmem:[#allocation5 + $0x2c] ss:$16 sps:$4 sm:$0xff]   ;;  %v1735_v6 = vld [vmem:[#allocation5 + $0x20] ss:$16 sps:$4 sm:$0xff]   ;;  %v1736_v7 = vld [vmem:[#allocation5 + $0x28] ss:$16 sps:$4 sm:$0xff]  }
  0x3b   :  { %537 = vmatprep.subr.bf16.mxu0 %v1731_v4  ;;  %650 = vmatprep.subr.bf16.mxu1 %v1733_v5  ;;  %v1737_v8 = vld [vmem:[#allocation5 + $0x44] ss:$16 sps:$4 sm:$0xff]   ;;  %v1739_v9 = vld [vmem:[#allocation5 + $0x4c] ss:$16 sps:$4 sm:$0xff]   ;;  %v1741_v10 = vld [vmem:[#allocation5 + $0x40] ss:$16 sps:$4 sm:$0xff]  }
  0x3c   :  { %v1742_v11 = vld [vmem:[#allocation5 + $0x48] ss:$16 sps:$4 sm:$0xff]   ;;  %v1743_v12 = vld [vmem:[#allocation5 + $0x64] ss:$16 sps:$4 sm:$0xff]   ;;  %v1745_v13 = vld [vmem:[#allocation5 + $0x6c] ss:$16 sps:$4 sm:$0xff]  }
  0x3d   :  { %v1747_v14 = vld [vmem:[#allocation5 + $0x60] ss:$16 sps:$4 sm:$0xff]   ;;  %v1748_v15 = vld [vmem:[#allocation5 + $0x68] ss:$16 sps:$4 sm:$0xff]   ;;  %v1749_v16 = vld [vmem:[#allocation5 + $0x84] ss:$16 sps:$4 sm:$0xff]  }
  0x3e   :  { %538 = vmatpush1.bf16.msra.mxu0 %v1735_v6  ;;  %651 = vmatpush1.bf16.msra.mxu1 %v1736_v7  ;;  %v1751_v17 = vld [vmem:[#allocation5 + $0x8c] ss:$16 sps:$4 sm:$0xff]   ;;  %v1753_v18 = vld [vmem:[#allocation5 + $0x80] ss:$16 sps:$4 sm:$0xff]   ;;  %v1754_v19 = vld [vmem:[#allocation5 + $0x88] ss:$16 sps:$4 sm:$0xff]  }
  0x3f   :  { %539 = vmatprep.subr.bf16.mxu0 %v1737_v8  ;;  %652 = vmatprep.subr.bf16.mxu1 %v1739_v9  ;;  %v1755_v20 = vld [vmem:[#allocation5 + $0xa4] ss:$16 sps:$4 sm:$0xff]   ;;  %v1757_v21 = vld [vmem:[#allocation5 + $0xac] ss:$16 sps:$4 sm:$0xff]   ;;  %v1759_v22 = vld [vmem:[#allocation5 + $0xa0] ss:$16 sps:$4 sm:$0xff]  }
  0x40   :  { %v1760_v23 = vld [vmem:[#allocation5 + $0xa8] ss:$16 sps:$4 sm:$0xff]   ;;  %v1761_v24 = vld [vmem:[#allocation5 + $0xc4] ss:$16 sps:$4 sm:$0xff]   ;;  %v1763_v25 = vld [vmem:[#allocation5 + $0xcc] ss:$16 sps:$4 sm:$0xff]  }
  0x41   :  { %v1765_v26 = vld [vmem:[#allocation5 + $0xc0] ss:$16 sps:$4 sm:$0xff]   ;;  %v1766_v27 = vld [vmem:[#allocation5 + $0xc8] ss:$16 sps:$4 sm:$0xff]   ;;  %v1767_v28 = vld [vmem:[#allocation5 + $0xe4] ss:$16 sps:$4 sm:$0xff]  }
  0x42   :  { %540 = vmatpush1.bf16.msra.mxu0 %v1741_v10  ;;  %653 = vmatpush1.bf16.msra.mxu1 %v1742_v11  ;;  %v1769_v29 = vld [vmem:[#allocation5 + $0xec] ss:$16 sps:$4 sm:$0xff]   ;;  %v1771_v30 = vld [vmem:[#allocation5 + $0xe0] ss:$16 sps:$4 sm:$0xff]   ;;  %v1772_v31 = vld [vmem:[#allocation5 + $0xe8] ss:$16 sps:$4 sm:$0xff]  }
  0x43   :  { %541 = vmatprep.subr.bf16.mxu0 %v1743_v12  ;;  %654 = vmatprep.subr.bf16.mxu1 %v1745_v13  ;;  %v1773_v32 = vld [vmem:[#allocation5 + $0x104] ss:$16 sps:$4 sm:$0xff]   ;;  %v1775_v33 = vld [vmem:[#allocation5 + $0x10c] ss:$16 sps:$4 sm:$0xff]   ;;  %v1777_v34 = vld [vmem:[#allocation5 + $0x100] ss:$16 sps:$4 sm:$0xff]  }
  0x44   :  { %v1778_v35 = vld [vmem:[#allocation5 + $0x108] ss:$16 sps:$4 sm:$0xff]   ;;  %v1779_v36 = vld [vmem:[#allocation5 + $0x124] ss:$16 sps:$4 sm:$0xff]   ;;  %v1781_v37 = vld [vmem:[#allocation5 + $0x12c] ss:$16 sps:$4 sm:$0xff]  }
  0x45   :  { %v1783_v38 = vld [vmem:[#allocation5 + $0x120] ss:$16 sps:$4 sm:$0xff]   ;;  %vm497_vm0 = vcmask 719872   ;;  %v1784_v39 = vld [vmem:[#allocation5 + $0x128] ss:$16 sps:$4 sm:$0xff]   ;;  %vm522_vm1 = vcmask 1043456  }
  0x46   :  { %542 = vmatpush1.bf16.msra.mxu0 %v1747_v14  ;;  %655 = vmatpush1.bf16.msra.mxu1 %v1748_v15  ;;  %v1809_v40 = vld [vmem:[#allocation2 + $0x4] ss:$8 sps:$4 sm:$0xff]   ;;  %v1789_v45 = vld [vmem:[#allocation5 + $0x140] ss:$16 sps:$4 sm:$0xff]   ;;  %v1790_v46 = vld [vmem:[#allocation5 + $0x148] ss:$16 sps:$4 sm:$0xff]  }
  0x47   :  { %543 = vmatprep.subr.bf16.mxu0 %v1749_v16  ;;  %656 = vmatprep.subr.bf16.mxu1 %v1751_v17  ;;  %v1785_v41 = vld [vmem:[#allocation5 + $0x144] ss:$16 sps:$4 sm:$0xff]   ;;  %v1787_v42 = vld [vmem:[#allocation5 + $0x14c] ss:$16 sps:$4 sm:$0xff]   ;;  %v1795_v51 = vld [vmem:[#allocation5 + $0x160] ss:$16 sps:$4 sm:$0xff]  }
  0x48   :  { %v131_v43 = vld [vmem:[#allocation5 + $0x1a0] sm:$0xff]  ;;  %1621 = vmatprep.mubr.msk.bf16.mxu0 %vm497_vm0, %v1809_v40  ;;  %1630 = vmatprep.mubr.msk.bf16.mxu1 %vm497_vm0, %v1809_v40  ;;  %v132_v44 = vld [vmem:[#allocation5 + $0x1a8] sm:$0xff]  ;;  %v1810_v62 = vld [vmem:[#allocation2 + $0x14] ss:$8 sps:$4 sm:$0xff]   ;;  %v135_v40 = vlaneseq  ;;  %vm1216_vm2 = vcmask 1041409   ;;  %vm1218_vm3 = vcmask 1042434  }
  0x49   :  { %v1791_v47 = vld [vmem:[#allocation5 + $0x164] ss:$16 sps:$4 sm:$0xff]   ;;  %v1793_v48 = vld [vmem:[#allocation5 + $0x16c] ss:$16 sps:$4 sm:$0xff]   ;;  %v1616_v49 = vcombine.low %v131_v43, %v131_v43  ;;  %v1618_v50 = vcombine.low %v132_v44, %v132_v44  ;;  %v1796_v52 = vld [vmem:[#allocation5 + $0x168] ss:$16 sps:$4 sm:$0xff]   ;;  %v1617_v59 = vcombine.high %v131_v43, %v131_v43  ;;  %v1619_v60 = vcombine.high %v132_v44, %v132_v44 }
  0x4a   :  { %544 = vmatpush1.bf16.msra.mxu0 %v1753_v18  ;;  %657 = vmatpush1.bf16.msra.mxu1 %v1754_v19  ;;  %v1797_v53 = vld [vmem:[#allocation5 + $0x184] ss:$16 sps:$4 sm:$0xff]   ;;  %v1799_v54 = vld [vmem:[#allocation5 + $0x18c] ss:$16 sps:$4 sm:$0xff]   ;;  %v1801_v55 = vld [vmem:[#allocation5 + $0x180] ss:$16 sps:$4 sm:$0xff]  }
  0x4b   :  { %545 = vmatprep.subr.bf16.mxu0 %v1755_v20  ;;  %658 = vmatprep.subr.bf16.mxu1 %v1757_v21  ;;  %v1802_v56 = vld [vmem:[#allocation5 + $0x188] ss:$16 sps:$4 sm:$0xff]   ;;  %v524_v57 = vsel %vm522_vm1, %v1616_v49, 0  ;;  %v530_v58 = vsel %vm522_vm1, %v1618_v50, 0  ;;  %v1813_v0 = vld [vmem:[#allocation2 + $0x24] ss:$8 sps:$4 sm:$0xff]  }
  0x4c   :  { %v1807_v61 = vld [vmem:[#allocation2] ss:$8 sps:$4 sm:$0xff]   ;;  %v1812_v63 = vld [vmem:[#allocation2 + $0x10] ss:$8 sps:$4 sm:$0xff]   ;;  %v1816_v2 = vld [vmem:[#allocation2 + $0x34] ss:$8 sps:$4 sm:$0xff]  }
  0x4d   :  { %v1815_v1 = vld [vmem:[#allocation2 + $0x20] ss:$8 sps:$4 sm:$0xff]   ;;  %v1818_v3 = vld [vmem:[#allocation2 + $0x30] ss:$8 sps:$4 sm:$0xff]   ;;  %v1819_v4 = vld [vmem:[#allocation2 + $0x44] ss:$8 sps:$4 sm:$0xff]  }
  0x4e   :  { %546 = vmatpush1.bf16.msra.mxu0 %v1759_v22  ;;  %659 = vmatpush1.bf16.msra.mxu1 %v1760_v23  ;;  %v1821_v5 = vld [vmem:[#allocation2 + $0x40] ss:$8 sps:$4 sm:$0xff]   ;;  %v1822_v6 = vld [vmem:[#allocation2 + $0x54] ss:$8 sps:$4 sm:$0xff]   ;;  %v1824_v7 = vld [vmem:[#allocation2 + $0x50] ss:$8 sps:$4 sm:$0xff]  }
  0x4f   :  { %547 = vmatprep.subr.bf16.mxu0 %v1761_v24  ;;  %660 = vmatprep.subr.bf16.mxu1 %v1763_v25  ;;  %v1825_v8 = vld [vmem:[#allocation2 + $0x64] ss:$8 sps:$4 sm:$0xff]   ;;  %v1827_v9 = vld [vmem:[#allocation2 + $0x60] ss:$8 sps:$4 sm:$0xff]   ;;  %v1828_v10 = vld [vmem:[#allocation2 + $0x74] ss:$8 sps:$4 sm:$0xff]  }
  0x50   :  { %v1830_v11 = vld [vmem:[#allocation2 + $0x70] ss:$8 sps:$4 sm:$0xff]   ;;  %v1839_v20 = vld [vmem:[#allocation7 + $0x50] sm:$0xff]   ;;  %v1843_v24 = vld [vmem:[#allocation7 + $0x58] sm:$0xff]   ;;  %vm1220_vm4 = vcmask 1043459   ;;  %vm1222_vm5 = vcmask 1044484  }
  0x51   :  { %v1831_v12 = vld [vmem:[#allocation7 + $0x40] sm:$0xff]   ;;  %v1835_v16 = vld [vmem:[#allocation7 + $0x48] sm:$0xff]   ;;  %v1840_v21 = vld [vmem:[#allocation7 + $0x10] sm:$0xff]   ;;  %vm1224_vm6 = vcmask 1045509   ;;  %vm1226_vm7 = vcmask 1046534   ;;  %vm1228_vm8 = vcmask 1047559  }
  0x52   :  { %548 = vmatpush1.bf16.msra.mxu0 %v1765_v26  ;;  %661 = vmatpush1.bf16.msra.mxu1 %v1766_v27  ;;  %v1832_v13 = vld [vmem:[#allocation7] sm:$0xff]   ;;  %v1836_v17 = vld [vmem:[#allocation7 + $0x8] sm:$0xff]   ;;  %v1841_v22 = vld [vmem:[#allocation7 + $0xd0] sm:$0xff]   ;;  %s1966_s10 = smov [#allocation8]  }
  0x53   :  { %549 = vmatprep.subr.bf16.mxu0 %v1767_v28  ;;  %662 = vmatprep.subr.bf16.mxu1 %v1769_v29  ;;  %v1833_v14 = vld [vmem:[#allocation7 + $0xc0] sm:$0xff]   ;;  %v1837_v18 = vld [vmem:[#allocation7 + $0xc8] sm:$0xff]   ;;  %v1842_v23 = vld [vmem:[#allocation7 + $0x90] sm:$0xff]   ;;  %s1538_s11 = sshll.u32 %s1966_s10, 4  ;;  %s1539_s11 = int_to_ptr.vmem [resolvable:$true] %s1538_s11 }
  0x54   :  { %v1834_v15 = vld [vmem:[#allocation7 + $0x80] sm:$0xff]   ;;  %v1838_v19 = vld [vmem:[#allocation7 + $0x88] sm:$0xff]   ;;  %v1844_v25 = vld [vmem:[#allocation7 + $0x18] sm:$0xff]   ;;  %s1929_s12 = scalar_lea.vmem %s1539_s11, 128  ;;  %p1934_p11 = scmp.lt.s32.totalorder %s1539_s11, %s1539_s11 }
  0x55   :  { %v1845_v26 = vld [vmem:[#allocation7 + $0xd8] sm:$0xff]   ;;  %v1847_v28 = vld [vmem:[#allocation7 + $0x60] sm:$0xff]   ;;  %p1930_p10 = scmp.ne.s32.totalorder %s1539_s11, %s1929_s12  ;;  %p1935_p12 = scmp.lt.s32.totalorder %s1929_s12, %s1929_s12 }
  0x56   :  { %550 = vmatpush1.bf16.msra.mxu0 %v1771_v30  ;;  %663 = vmatpush1.bf16.msra.mxu1 %v1772_v31  ;;  %v1846_v27 = vld [vmem:[#allocation7 + $0x98] sm:$0xff]   ;;  %v1849_v29 = vld [vmem:[#allocation7 + $0xe0] sm:$0xff]  }
  0x57   :  { %551 = vmatprep.subr.bf16.mxu0 %v1773_v32  ;;  %664 = vmatprep.subr.bf16.mxu1 %v1775_v33  ;;  %v1848_v30 = vld [vmem:[#allocation7 + $0x20] sm:$0xff]   ;;  %v1851_v32 = vld [vmem:[#allocation7 + $0x68] sm:$0xff]   ;;  %v1861_v43 = vld [vmem:[#allocation7 + $0xf8] sm:$0xff]   ;;  %p1936_p13 = por %p1935_p12, %p1934_p11 }
  0x58   :  { %v1850_v31 = vld [vmem:[#allocation7 + $0xa0] sm:$0xff]   ;;  %v1853_v33 = vld [vmem:[#allocation7 + $0xe8] sm:$0xff]   ;;  %v1862_v44 = vld [vmem:[#allocation7 + $0xb8] sm:$0xff]  }
  0x59   :  { %p1937_p0 = pnand %p1936_p13, %p1930_p10 }
  0x5a   :  { %552 = vmatpush1.bf16.msra.mxu0 %v1777_v34  ;;  %665 = vmatpush1.bf16.msra.mxu1 %v1778_v35  ;;  %v1852_v34 = vld [vmem:[#allocation7 + $0x28] sm:$0xff]  }
  0x5b   :  { %553 = vmatprep.subr.bf16.mxu0 %v1779_v36  ;;  %666 = vmatprep.subr.bf16.mxu1 %v1781_v37  ;;  %v1854_v35 = vld [vmem:[#allocation7 + $0xa8] sm:$0xff]   ;;  %v1855_v36 = vld [vmem:[#allocation7 + $0x70] sm:$0xff]  }
  0x5c   :  { %v1857_v37 = vld [vmem:[#allocation7 + $0xf0] sm:$0xff]  }
  0x5e   :  { %554 = vmatpush1.bf16.msra.mxu0 %v1783_v38  ;;  %667 = vmatpush1.bf16.msra.mxu1 %v1784_v39  ;;  %v1856_v38 = vld [vmem:[#allocation7 + $0x30] sm:$0xff]  }
  0x5f   :  { %555 = vmatprep.subr.bf16.mxu0 %v1785_v41  ;;  %668 = vmatprep.subr.bf16.mxu1 %v1787_v42  ;;  %v1858_v39 = vld [vmem:[#allocation7 + $0xb0] sm:$0xff]   ;;  %v1859_v41 = vld [vmem:[#allocation7 + $0x78] sm:$0xff]  }
  0x60   :  { %v1860_v42 = vld [vmem:[#allocation7 + $0x38] sm:$0xff]  }
  0x62   :  { %556 = vmatpush1.bf16.msra.mxu0 %v1789_v45  ;;  %669 = vmatpush1.bf16.msra.mxu1 %v1790_v46  ;;  %v136_v45 = vshrl.u32 %v135_v40, 7 }
  0x63   :  { %557 = vmatprep.subr.bf16.mxu0 %v1791_v47  ;;  %670 = vmatprep.subr.bf16.mxu1 %v1793_v48  ;;  %v133_v48 = vld [vmem:[%s2355_s2] sm:$0xf] }
  0x64   :  { %v137_v46 = vsub.s32 0, %v136_v45  ;;  %v145_v47 = vsub.s32 2, %v136_v45  ;;  %v141_v49 = vsub.s32 1, %v136_v45  ;;  %v149_v50 = vsub.s32 3, %v136_v45 }
  0x66   :  { %558 = vmatpush1.bf16.msra.mxu0 %v1795_v51  ;;  %671 = vmatpush1.bf16.msra.mxu1 %v1796_v52  ;;  %v2056_v51 = vrot.slane %v133_v48, %v137_v46  ;;  %v2058_v52 = vrot.slane %v133_v48, %v145_v47 }
  0x67   :  { %559 = vmatprep.subr.bf16.mxu0 %v1797_v53  ;;  %672 = vmatprep.subr.bf16.mxu1 %v1799_v54  ;;  %v2060_v53 = vrot.slane %v133_v48, %v141_v49  ;;  %v2062_v54 = vrot.slane %v133_v48, %v149_v50 }
  0x6a   :  { %560 = vmatpush1.bf16.msra.mxu0 %v1801_v55  ;;  %673 = vmatpush1.bf16.msra.mxu1 %v1802_v56 }
  0x6b   :  { %1620 = vmatprep.subr.msk.bf16.mxu0 %vm522_vm1, %v1617_v59  ;;  %1629 = vmatprep.subr.msk.bf16.mxu1 %vm522_vm1, %v1619_v60 }
  0x6e   :  { %562 = vmatpush1.bf16.msra.mxu0 %v524_v57  ;;  %675 = vmatpush1.bf16.msra.mxu1 %v530_v58 }
  0x6f   :  { %1671 = vmatprep.subr.bf16.mxu0 %v1831_v12  ;;  %1693 = vmatprep.subr.bf16.mxu1 %v1833_v14 }
  0x71   :  { %568 = vmatmul.mubr.bf16.vlgmr.msra.gmra.mrb[0].mxu0 %v1807_v61  ;;  %681 = vmatmul.mubr.bf16.vlgmr.msra.gmra.mrb[0].mxu1 %v1807_v61 }
  0x72   :  { %1622 = vmatprep.mubr.msk.bf16.mxu0 %vm497_vm0, %v1810_v62  ;;  %1631 = vmatprep.mubr.msk.bf16.mxu1 %vm497_vm0, %v1810_v62 }
  0x73   :  { %1672 = vmatpush3.bf16.msra.mxu0 %v1832_v13  ;;  %1694 = vmatpush3.bf16.msra.mxu1 %v1834_v15 }
  0x74   :  { %1673 = vmatprep.subr.bf16.mxu0 %v1835_v16  ;;  %1695 = vmatprep.subr.bf16.mxu1 %v1837_v18 }
  0x77   :  { %1674 = vmatpush3.bf16.msra.mxu0 %v1836_v17  ;;  %1696 = vmatpush3.bf16.msra.mxu1 %v1838_v19 }
  0x78   :  { %1675 = vmatprep.subr.bf16.mxu0 %v1839_v20  ;;  %1697 = vmatprep.subr.bf16.mxu1 %v1841_v22 }
  0x79   :  { %578 = vmatmul.mubr.bf16.gmra.mrb[4].mxu0 %v1812_v63  ;;  %691 = vmatmul.mubr.bf16.gmra.mrb[4].mxu1 %v1812_v63 }
  0x7a   :  { %1623 = vmatprep.mubr.msk.bf16.mxu0 %vm497_vm0, %v1813_v0  ;;  %1632 = vmatprep.mubr.msk.bf16.mxu1 %vm497_vm0, %v1813_v0 }
  0x7b   :  { %1676 = vmatpush3.bf16.msra.mxu0 %v1840_v21  ;;  %1698 = vmatpush3.bf16.msra.mxu1 %v1842_v23 }
  0x7c   :  { %1677 = vmatprep.subr.bf16.mxu0 %v1843_v24  ;;  %1699 = vmatprep.subr.bf16.mxu1 %v1845_v26 }
  0x7f   :  { %1678 = vmatpush3.bf16.msra.mxu0 %v1844_v25  ;;  %1700 = vmatpush3.bf16.msra.mxu1 %v1846_v27 }
  0x80   :  { %1679 = vmatprep.subr.bf16.mxu0 %v1847_v28  ;;  %1701 = vmatprep.subr.bf16.mxu1 %v1849_v29 }
  0x81   :  { %588 = vmatmul.mubr.bf16.gmra.mrb[8].mxu0 %v1815_v1  ;;  %701 = vmatmul.mubr.bf16.gmra.mrb[8].mxu1 %v1815_v1 }
  0x82   :  { %1624 = vmatprep.mubr.msk.bf16.mxu0 %vm497_vm0, %v1816_v2  ;;  %1633 = vmatprep.mubr.msk.bf16.mxu1 %vm497_vm0, %v1816_v2 }
  0x83   :  { %1680 = vmatpush3.bf16.msra.mxu0 %v1848_v30  ;;  %1702 = vmatpush3.bf16.msra.mxu1 %v1850_v31 }
  0x84   :  { %1681 = vmatprep.subr.bf16.mxu0 %v1851_v32  ;;  %1703 = vmatprep.subr.bf16.mxu1 %v1853_v33 }
  0x87   :  { %1682 = vmatpush3.bf16.msra.mxu0 %v1852_v34  ;;  %1704 = vmatpush3.bf16.msra.mxu1 %v1854_v35 }
  0x88   :  { %1683 = vmatprep.subr.bf16.mxu0 %v1855_v36  ;;  %1705 = vmatprep.subr.bf16.mxu1 %v1857_v37 }
  0x89   :  { %598 = vmatmul.mubr.bf16.gmra.mrb[12].mxu0 %v1818_v3  ;;  %711 = vmatmul.mubr.bf16.gmra.mrb[12].mxu1 %v1818_v3 }
  0x8a   :  { %1625 = vmatprep.mubr.msk.bf16.mxu0 %vm497_vm0, %v1819_v4  ;;  %1634 = vmatprep.mubr.msk.bf16.mxu1 %vm497_vm0, %v1819_v4 }
  0x8b   :  { %1684 = vmatpush3.bf16.msra.mxu0 %v1856_v38  ;;  %1706 = vmatpush3.bf16.msra.mxu1 %v1858_v39 }
  0x8c   :  { %1685 = vmatprep.subr.bf16.mxu0 %v1859_v41  ;;  %1707 = vmatprep.subr.bf16.mxu1 %v1861_v43 }
  0x8f   :  { %1686 = vmatpush3.bf16.msra.mxu0 %v1860_v42  ;;  %1708 = vmatpush3.bf16.msra.mxu1 %v1862_v44 }
  0x91   :  { %608 = vmatmul.mubr.bf16.gmra.mrb[16].mxu0 %v1821_v5  ;;  %721 = vmatmul.mubr.bf16.gmra.mrb[16].mxu1 %v1821_v5 }
  0x92   :  { %1626 = vmatprep.mubr.msk.bf16.mxu0 %vm497_vm0, %v1822_v6  ;;  %1635 = vmatprep.mubr.msk.bf16.mxu1 %vm497_vm0, %v1822_v6 }
  0x99   :  { %618 = vmatmul.mubr.bf16.gmra.mrb[20].mxu0 %v1824_v7  ;;  %731 = vmatmul.mubr.bf16.gmra.mrb[20].mxu1 %v1824_v7 }
  0x9a   :  { %1627 = vmatprep.mubr.msk.bf16.mxu0 %vm497_vm0, %v1825_v8  ;;  %1636 = vmatprep.mubr.msk.bf16.mxu1 %vm497_vm0, %v1825_v8 }
  0xa1   :  { %628 = vmatmul.mubr.bf16.gmra.mrb[24].mxu0 %v1827_v9  ;;  %741 = vmatmul.mubr.bf16.gmra.mrb[24].mxu1 %v1827_v9 }
  0xa2   :  { %1628 = vmatprep.mubr.msk.bf16.mxu0 %vm497_vm0, %v1828_v10  ;;  %1637 = vmatprep.mubr.msk.bf16.mxu1 %vm497_vm0, %v1828_v10 }
  0xa9   :  { %638 = vmatmul.mubr.bf16.gmra.mrb[28].mxu0 %v1830_v11  ;;  %751 = vmatmul.mubr.bf16.gmra.mrb[28].mxu1 %v1830_v11 }
 0x144   :  { %v569_v55 = vpop.f32.mrb[0].mxu0  ;;  %v682_v56 = vpop.f32.mrb[0].mxu1 }
 0x145   :  { %v570_v57 = vadd.f32 %v569_v55, %v2056_v51  ;;  %v683_v58 = vadd.f32 %v682_v56, %v2058_v52  ;;  %v571_v59 = vpop.f32.mrb[1].mxu0  ;;  %v684_v60 = vpop.f32.mrb[1].mxu1 }
 0x146   :  { %v572_v61 = vadd.f32 %v571_v59, %v2060_v53  ;;  %v685_v62 = vadd.f32 %v684_v60, %v2062_v54  ;;  %v573_v63 = vpop.f32.mrb[2].mxu0  ;;  %v686_v0 = vpop.f32.mrb[2].mxu1 }
 0x147   :  { %v763_v1 = vmax.f32 %v683_v58, 0.0  ;;  %v574_v2 = vadd.f32 %v573_v63, %v2056_v51  ;;  %v687_v3 = vadd.f32 %v686_v0, %v2058_v52  ;;  %v575_v4 = vpop.f32.mrb[3].mxu0  ;;  %v688_v5 = vpop.f32.mrb[3].mxu1  ;;  %v761_v9 = vmax.f32 %v570_v57, 0.0 }
 0x148   :  { %v764_v6 = vmax.f32 %v685_v62, 0.0  ;;  %v576_v7 = vadd.f32 %v575_v4, %v2060_v53  ;;  %v689_v8 = vadd.f32 %v688_v5, %v2062_v54  ;;  %v762_v12 = vmax.f32 %v572_v61, 0.0 }
 0x149   :  { %v765_v10 = vmax.f32 %v574_v2, 0.0  ;;  %v767_v11 = vmax.f32 %v687_v3, 0.0 }
 0x14a   :  { %v766_v13 = vmax.f32 %v576_v7, 0.0  ;;  %v768_v14 = vmax.f32 %v689_v8, 0.0 }
 0x14b   :  { %v825_v15 = vadd.f32 %v765_v10, %v761_v9  ;;  %v839_v16 = vadd.f32 %v767_v11, %v763_v1 }
 0x14c   :  { %v832_v17 = vadd.f32 %v766_v13, %v762_v12  ;;  %v846_v18 = vadd.f32 %v768_v14, %v764_v6  ;;  %v579_v19 = vpop.f32.mrb[4].mxu0  ;;  %v692_v20 = vpop.f32.mrb[4].mxu1 }
 0x14d   :  { %v826_v21 = vrot.slane %v825_v15, 4  ;;  %v840_v22 = vrot.slane %v839_v16, 4  ;;  %v580_v23 = vadd.f32 %v579_v19, %v2056_v51  ;;  %v693_v24 = vadd.f32 %v692_v20, %v2058_v52  ;;  %v581_v25 = vpop.f32.mrb[5].mxu0  ;;  %v694_v26 = vpop.f32.mrb[5].mxu1 }
 0x14e   :  { %v833_v27 = vrot.slane %v832_v17, 4  ;;  %v847_v28 = vrot.slane %v846_v18, 4  ;;  %v582_v29 = vadd.f32 %v581_v25, %v2060_v53  ;;  %v695_v30 = vadd.f32 %v694_v26, %v2062_v54  ;;  %v583_v31 = vpop.f32.mrb[6].mxu0  ;;  %v696_v32 = vpop.f32.mrb[6].mxu1 }
 0x14f   :  { %v827_v33 = vadd.f32 %v826_v21, %v825_v15  ;;  %v841_v34 = vadd.f32 %v840_v22, %v839_v16  ;;  %v769_v35 = vmax.f32 %v580_v23, 0.0  ;;  %v771_v36 = vmax.f32 %v693_v24, 0.0  ;;  %v585_v37 = vpop.f32.mrb[7].mxu0  ;;  %v698_v38 = vpop.f32.mrb[7].mxu1 }
 0x150   :  { %v834_v39 = vadd.f32 %v833_v27, %v832_v17  ;;  %v848_v40 = vadd.f32 %v847_v28, %v846_v18  ;;  %v770_v41 = vmax.f32 %v582_v29, 0.0  ;;  %v772_v42 = vmax.f32 %v695_v30, 0.0 }
 0x151   :  { %v828_v43 = vrot.slane %v827_v33, 2  ;;  %v842_v44 = vrot.slane %v841_v34, 2  ;;  %v584_v45 = vadd.f32 %v583_v31, %v2056_v51  ;;  %v697_v46 = vadd.f32 %v696_v32, %v2058_v52 }
 0x152   :  { %v835_v47 = vrot.slane %v834_v39, 2  ;;  %v849_v48 = vrot.slane %v848_v40, 2  ;;  %v586_v49 = vadd.f32 %v585_v37, %v2060_v53  ;;  %v699_v50 = vadd.f32 %v698_v38, %v2062_v54 }
 0x153   :  { %v829_v55 = vadd.f32 %v828_v43, %v827_v33  ;;  %v843_v56 = vadd.f32 %v842_v44, %v841_v34  ;;  %v773_v57 = vmax.f32 %v584_v45, 0.0  ;;  %v775_v58 = vmax.f32 %v697_v46, 0.0 }
 0x154   :  { %v836_v59 = vadd.f32 %v835_v47, %v834_v39  ;;  %v850_v60 = vadd.f32 %v849_v48, %v848_v40  ;;  %v774_v61 = vmax.f32 %v586_v49, 0.0  ;;  %v776_v62 = vmax.f32 %v699_v50, 0.0  ;;  %v589_v63 = vpop.f32.mrb[8].mxu0  ;;  %v702_v0 = vpop.f32.mrb[8].mxu1 }
 0x155   :  { %v830_v1 = vrot.slane %v829_v55, 1  ;;  %v844_v2 = vrot.slane %v843_v56, 1  ;;  %v853_v3 = vadd.f32 %v773_v57, %v769_v35  ;;  %v867_v4 = vadd.f32 %v775_v58, %v771_v36  ;;  %v591_v5 = vpop.f32.mrb[9].mxu0  ;;  %v704_v6 = vpop.f32.mrb[9].mxu1 }
 0x156   :  { %v837_v7 = vrot.slane %v836_v59, 1  ;;  %v851_v8 = vrot.slane %v850_v60, 1  ;;  %v860_v9 = vadd.f32 %v774_v61, %v770_v41  ;;  %v874_v10 = vadd.f32 %v776_v62, %v772_v42  ;;  %v593_v11 = vpop.f32.mrb[10].mxu0  ;;  %v706_v12 = vpop.f32.mrb[10].mxu1 }
 0x157   :  { %v831_v13 = vadd.f32 %v830_v1, %v829_v55  ;;  %v845_v14 = vadd.f32 %v844_v2, %v843_v56  ;;  %v854_v15 = vrot.slane %v853_v3, 4  ;;  %v868_v16 = vrot.slane %v867_v4, 4  ;;  %v595_v17 = vpop.f32.mrb[11].mxu0  ;;  %v708_v18 = vpop.f32.mrb[11].mxu1 }
 0x158   :  { %v838_v19 = vadd.f32 %v837_v7, %v836_v59  ;;  %v852_v20 = vadd.f32 %v851_v8, %v850_v60  ;;  %v861_v21 = vrot.slane %v860_v9, 4  ;;  %v875_v22 = vrot.slane %v874_v10, 4 }
 0x159   :  { %v1049_v23 = vpack.c.bf16 %v831_v13, %v831_v13  ;;  %v1051_v24 = vpack.c.bf16 %v845_v14, %v845_v14  ;;  %v855_v25 = vadd.f32 %v854_v15, %v853_v3  ;;  %v869_v26 = vadd.f32 %v868_v16, %v867_v4 }
 0x15a   :  { %v1050_v27 = vpack.c.bf16 %v838_v19, %v838_v19  ;;  %v1052_v28 = vpack.c.bf16 %v852_v20, %v852_v20  ;;  %v862_v29 = vadd.f32 %v861_v21, %v860_v9  ;;  %v876_v30 = vadd.f32 %v875_v22, %v874_v10 }
 0x15b   :  { %v2080_v31 = vunpack.c.l.b16 %v1049_v23  ;;  %v2082_v32 = vunpack.c.l.b16 %v1051_v24  ;;  %v856_v33 = vrot.slane %v855_v25, 2  ;;  %v870_v34 = vrot.slane %v869_v26, 2 }
 0x15c   :  { %v2084_v35 = vunpack.c.l.b16 %v1050_v27  ;;  %v2086_v36 = vunpack.c.l.b16 %v1052_v28  ;;  %v863_v37 = vrot.slane %v862_v29, 2  ;;  %v877_v38 = vrot.slane %v876_v30, 2  ;;  %v2088_v39 = vpop.f32.mrb[12].mxu0  ;;  %v2090_v40 = vpop.f32.mrb[12].mxu1 }
 0x15d   :  { %v857_v41 = vadd.f32 %v856_v33, %v855_v25  ;;  %v871_v42 = vadd.f32 %v870_v34, %v869_v26  ;;  %v590_v43 = vadd.f32 %v589_v63, %v2056_v51  ;;  %v703_v44 = vadd.f32 %v702_v0, %v2058_v52  ;;  %v2094_v45 = vpop.f32.mrb[13].mxu0  ;;  %v2096_v46 = vpop.f32.mrb[13].mxu1 }
 0x15e   :  { %v864_v47 = vadd.f32 %v863_v37, %v862_v29  ;;  %v878_v48 = vadd.f32 %v877_v38, %v876_v30  ;;  %v592_v49 = vadd.f32 %v591_v5, %v2060_v53  ;;  %v705_v50 = vadd.f32 %v704_v6, %v2062_v54  ;;  %v2100_v55 = vpop.f32.mrb[14].mxu0  ;;  %v2102_v56 = vpop.f32.mrb[14].mxu1 }
 0x15f   :  { %v858_v57 = vrot.slane %v857_v41, 1  ;;  %v872_v58 = vrot.slane %v871_v42, 1  ;;  %v777_v59 = vmax.f32 %v590_v43, 0.0  ;;  %v779_v60 = vmax.f32 %v703_v44, 0.0  ;;  %v2104_v61 = vpop.f32.mrb[15].mxu0  ;;  %v2106_v62 = vpop.f32.mrb[15].mxu1 }
 0x160   :  { %v865_v63 = vrot.slane %v864_v47, 1  ;;  %v879_v0 = vrot.slane %v878_v48, 1  ;;  %v778_v1 = vmax.f32 %v592_v49, 0.0  ;;  %v780_v2 = vmax.f32 %v705_v50, 0.0 }
 0x161   :  { %v859_v3 = vadd.f32 %v858_v57, %v857_v41  ;;  %v873_v4 = vadd.f32 %v872_v58, %v871_v42  ;;  %v594_v5 = vadd.f32 %v593_v11, %v2056_v51  ;;  %v707_v6 = vadd.f32 %v706_v12, %v2058_v52 }
 0x162   :  { %v866_v7 = vadd.f32 %v865_v63, %v864_v47  ;;  %v880_v8 = vadd.f32 %v879_v0, %v878_v48  ;;  %v596_v9 = vadd.f32 %v595_v17, %v2060_v53  ;;  %v709_v10 = vadd.f32 %v708_v18, %v2062_v54 }
 0x163   :  { %v1053_v13 = vpack.c.bf16 %v859_v3, %v859_v3  ;;  %v1055_v14 = vpack.c.bf16 %v873_v4, %v873_v4  ;;  %v781_v15 = vmax.f32 %v594_v5, 0.0  ;;  %v783_v16 = vmax.f32 %v707_v6, 0.0 }
 0x164   :  { %v1054_v19 = vpack.c.bf16 %v866_v7, %v866_v7  ;;  %v1056_v20 = vpack.c.bf16 %v880_v8, %v880_v8  ;;  %v782_v21 = vmax.f32 %v596_v9, 0.0  ;;  %v784_v22 = vmax.f32 %v709_v10, 0.0  ;;  %v2112_v23 = vpop.f32.mrb[16].mxu0  ;;  %v2114_v24 = vpop.f32.mrb[16].mxu1 }
 0x165   :  { %v1188_v11 = vunpack.c.l.b16 %v1053_v13  ;;  %v1190_v12 = vunpack.c.l.b16 %v1055_v14  ;;  %v881_v25 = vadd.f32 %v781_v15, %v777_v59  ;;  %v895_v26 = vadd.f32 %v783_v16, %v779_v60  ;;  %v2116_v27 = vpop.f32.mrb[17].mxu0  ;;  %v2118_v17 = vpop.f32.mrb[17].mxu1 }
 0x166   :  { %v1189_v18 = vunpack.c.l.b16 %v1054_v19  ;;  %v1191_v28 = vunpack.c.l.b16 %v1056_v20  ;;  %v888_v29 = vadd.f32 %v782_v21, %v778_v1  ;;  %v902_v30 = vadd.f32 %v784_v22, %v780_v2  ;;  %v2120_v33 = vpop.f32.mrb[18].mxu0  ;;  %v2122_v34 = vpop.f32.mrb[18].mxu1 }
 0x167   :  { %v2126_v37 = vsel %vm1216_vm2, %v1188_v11, %v2080_v31  ;;  %v2130_v38 = vsel %vm1216_vm2, %v1190_v12, %v2082_v32  ;;  %v882_v41 = vrot.slane %v881_v25, 4  ;;  %v896_v42 = vrot.slane %v895_v26, 4  ;;  %v2132_v43 = vpop.f32.mrb[19].mxu0  ;;  %v2134_v44 = vpop.f32.mrb[19].mxu1 }
 0x168   :  { %v2138_v47 = vsel %vm1216_vm2, %v1189_v18, %v2084_v35  ;;  %v2142_v48 = vsel %vm1216_vm2, %v1191_v28, %v2086_v36  ;;  %v889_v31 = vrot.slane %v888_v29, 4  ;;  %v903_v49 = vrot.slane %v902_v30, 4 }
 0x169   :  { %v883_v50 = vadd.f32 %v882_v41, %v881_v25  ;;  %v897_v57 = vadd.f32 %v896_v42, %v895_v26  ;;  %v600_v32 = vadd.f32 %v2088_v39, %v2056_v51  ;;  %v713_v58 = vadd.f32 %v2090_v40, %v2058_v52 }
 0x16a   :  { %v890_v59 = vadd.f32 %v889_v31, %v888_v29  ;;  %v904_v60 = vadd.f32 %v903_v49, %v902_v30  ;;  %v602_v35 = vadd.f32 %v2094_v45, %v2060_v53  ;;  %v715_v63 = vadd.f32 %v2096_v46, %v2062_v54 }
 0x16b   :  { %v884_v36 = vrot.slane %v883_v50, 2  ;;  %v898_v0 = vrot.slane %v897_v57, 2  ;;  %v785_v1 = vmax.f32 %v600_v32, 0.0  ;;  %v787_v2 = vmax.f32 %v713_v58, 0.0 }
 0x16c   :  { %v891_v3 = vrot.slane %v890_v59, 2  ;;  %v905_v4 = vrot.slane %v904_v60, 2  ;;  %v786_v5 = vmax.f32 %v602_v35, 0.0  ;;  %v788_v39 = vmax.f32 %v715_v63, 0.0  ;;  %v2152_v6 = vpop.f32.mrb[20].mxu0  ;;  %v2154_v40 = vpop.f32.mrb[20].mxu1 }
 0x16d   :  { %v885_v7 = vadd.f32 %v884_v36, %v883_v50  ;;  %v899_v8 = vadd.f32 %v898_v0, %v897_v57  ;;  %v604_v45 = vadd.f32 %v2100_v55, %v2056_v51  ;;  %v717_v46 = vadd.f32 %v2102_v56, %v2058_v52  ;;  %v2160_v9 = vpop.f32.mrb[21].mxu0  ;;  %v2162_v10 = vpop.f32.mrb[21].mxu1 }
 0x16e   :  { %v892_v13 = vadd.f32 %v891_v3, %v890_v59  ;;  %v906_v14 = vadd.f32 %v905_v4, %v904_v60  ;;  %v606_v15 = vadd.f32 %v2104_v61, %v2060_v53  ;;  %v719_v16 = vadd.f32 %v2106_v62, %v2062_v54  ;;  %v2168_v19 = vpop.f32.mrb[22].mxu0  ;;  %v2170_v20 = vpop.f32.mrb[22].mxu1 }
 0x16f   :  { %v886_v55 = vrot.slane %v885_v7, 1  ;;  %v900_v21 = vrot.slane %v899_v8, 1  ;;  %v789_v22 = vmax.f32 %v604_v45, 0.0  ;;  %v791_v56 = vmax.f32 %v717_v46, 0.0  ;;  %v2172_v11 = vpop.f32.mrb[23].mxu0  ;;  %v2174_v12 = vpop.f32.mrb[23].mxu1 }
 0x170   :  { %v893_v25 = vrot.slane %v892_v13, 1  ;;  %v907_v26 = vrot.slane %v906_v14, 1  ;;  %v790_v18 = vmax.f32 %v606_v15, 0.0  ;;  %v792_v28 = vmax.f32 %v719_v16, 0.0 }
 0x171   :  { %v887_v61 = vadd.f32 %v886_v55, %v885_v7  ;;  %v901_v29 = vadd.f32 %v900_v21, %v899_v8  ;;  %v909_v30 = vadd.f32 %v789_v22, %v785_v1  ;;  %v923_v62 = vadd.f32 %v791_v56, %v787_v2 }
 0x172   :  { %v894_v41 = vadd.f32 %v893_v25, %v892_v13  ;;  %v908_v42 = vadd.f32 %v907_v26, %v906_v14  ;;  %v916_v31 = vadd.f32 %v790_v18, %v786_v5  ;;  %v930_v49 = vadd.f32 %v792_v28, %v788_v39 }
 0x173   :  { %v1057_v50 = vpack.c.bf16 %v887_v61, %v887_v61  ;;  %v1059_v57 = vpack.c.bf16 %v901_v29, %v901_v29  ;;  %v910_v32 = vrot.slane %v909_v30, 4  ;;  %v924_v58 = vrot.slane %v923_v62, 4 }
 0x174   :  { %v1058_v59 = vpack.c.bf16 %v894_v41, %v894_v41  ;;  %v1060_v60 = vpack.c.bf16 %v908_v42, %v908_v42  ;;  %v917_v35 = vrot.slane %v916_v31, 4  ;;  %v931_v63 = vrot.slane %v930_v49, 4  ;;  %v2176_v36 = vpop.f32.mrb[24].mxu0  ;;  %v2178_v0 = vpop.f32.mrb[24].mxu1 }
 0x175   :  { %v1192_v3 = vunpack.c.l.b16 %v1057_v50  ;;  %v1194_v4 = vunpack.c.l.b16 %v1059_v57  ;;  %v911_v1 = vadd.f32 %v910_v32, %v909_v30  ;;  %v925_v2 = vadd.f32 %v924_v58, %v923_v62  ;;  %v2180_v7 = vpop.f32.mrb[25].mxu0  ;;  %v2182_v5 = vpop.f32.mrb[25].mxu1 }
 0x176   :  { %v1193_v39 = vunpack.c.l.b16 %v1058_v59  ;;  %v1195_v8 = vunpack.c.l.b16 %v1060_v60  ;;  %v918_v45 = vadd.f32 %v917_v35, %v916_v31  ;;  %v932_v46 = vadd.f32 %v931_v63, %v930_v49  ;;  %v2184_v13 = vpop.f32.mrb[26].mxu0  ;;  %v2186_v14 = vpop.f32.mrb[26].mxu1 }
 0x177   :  { %v1219_v15 = vsel %vm1218_vm3, %v1192_v3, %v2126_v37  ;;  %v1238_v16 = vsel %vm1218_vm3, %v1194_v4, %v2130_v38  ;;  %v912_v55 = vrot.slane %v911_v1, 2  ;;  %v926_v21 = vrot.slane %v925_v2, 2  ;;  %v2192_v22 = vpop.f32.mrb[27].mxu0  ;;  %v2194_v56 = vpop.f32.mrb[27].mxu1 }
 0x178   :  { %v2198_v25 = vsel %vm1218_vm3, %v1193_v39, %v2138_v47  ;;  %v2202_v26 = vsel %vm1218_vm3, %v1195_v8, %v2142_v48  ;;  %v919_v18 = vrot.slane %v918_v45, 2  ;;  %v933_v37 = vrot.slane %v932_v46, 2 }
 0x179   :  { %v913_v28 = vadd.f32 %v912_v55, %v911_v1  ;;  %v927_v61 = vadd.f32 %v926_v21, %v925_v2  ;;  %v610_v38 = vadd.f32 %v2112_v23, %v2056_v51  ;;  %v723_v29 = vadd.f32 %v2114_v24, %v2058_v52 }
 0x17a   :  { %v920_v30 = vadd.f32 %v919_v18, %v918_v45  ;;  %v934_v62 = vadd.f32 %v933_v37, %v932_v46  ;;  %v612_v47 = vadd.f32 %v2116_v27, %v2060_v53  ;;  %v725_v48 = vadd.f32 %v2118_v17, %v2062_v54 }
 0x17b   :  { %v914_v41 = vrot.slane %v913_v28, 1  ;;  %v928_v42 = vrot.slane %v927_v61, 1  ;;  %v793_v31 = vmax.f32 %v610_v38, 0.0  ;;  %v795_v49 = vmax.f32 %v723_v29, 0.0 }
 0x17c   :  { %v921_v50 = vrot.slane %v920_v30, 1  ;;  %v935_v57 = vrot.slane %v934_v62, 1  ;;  %v794_v32 = vmax.f32 %v612_v47, 0.0  ;;  %v796_v58 = vmax.f32 %v725_v48, 0.0  ;;  %v2212_v23 = vpop.f32.mrb[28].mxu0  ;;  %v2214_v59 = vpop.f32.mrb[28].mxu1 }
 0x17d   :  { %v915_v24 = vadd.f32 %v914_v41, %v913_v28  ;;  %v929_v60 = vadd.f32 %v928_v42, %v927_v61  ;;  %v614_v27 = vadd.f32 %v2120_v33, %v2056_v51  ;;  %v727_v17 = vadd.f32 %v2122_v34, %v2058_v52  ;;  %v2220_v35 = vpop.f32.mrb[29].mxu0  ;;  %v2222_v63 = vpop.f32.mrb[29].mxu1 }
 0x17e   :  { %v922_v3 = vadd.f32 %v921_v50, %v920_v30  ;;  %v936_v4 = vadd.f32 %v935_v57, %v934_v62  ;;  %v616_v1 = vadd.f32 %v2132_v43, %v2060_v53  ;;  %v729_v2 = vadd.f32 %v2134_v44, %v2062_v54  ;;  %v2228_v39 = vpop.f32.mrb[30].mxu0  ;;  %v2230_v8 = vpop.f32.mrb[30].mxu1 }
 0x17f   :  { %v1061_v33 = vpack.c.bf16 %v915_v24, %v915_v24  ;;  %v1063_v45 = vpack.c.bf16 %v929_v60, %v929_v60  ;;  %v797_v46 = vmax.f32 %v614_v27, 0.0  ;;  %v799_v34 = vmax.f32 %v727_v17, 0.0  ;;  %v2232_v55 = vpop.f32.mrb[31].mxu0  ;;  %v2234_v21 = vpop.f32.mrb[31].mxu1 }
 0x180   :  { %v1062_v18 = vpack.c.bf16 %v922_v3, %v922_v3  ;;  %v1064_v37 = vpack.c.bf16 %v936_v4, %v936_v4  ;;  %v798_v28 = vmax.f32 %v616_v1, 0.0  ;;  %v800_v61 = vmax.f32 %v729_v2, 0.0 }
 0x181   :  { %v1196_v43 = vunpack.c.l.b16 %v1061_v33  ;;  %v1198_v38 = vunpack.c.l.b16 %v1063_v45  ;;  %v937_v29 = vadd.f32 %v797_v46, %v793_v31  ;;  %v951_v44 = vadd.f32 %v799_v34, %v795_v49 }
 0x182   :  { %v2236_v30 = vunpack.c.l.b16 %v1062_v18  ;;  %v2238_v62 = vunpack.c.l.b16 %v1064_v37  ;;  %v944_v47 = vadd.f32 %v798_v28, %v794_v32  ;;  %v958_v48 = vadd.f32 %v800_v61, %v796_v58 }
 0x183   :  { %v2241_v41 = vsel %vm1220_vm4, %v1196_v43, %v1219_v15  ;;  %v2244_v42 = vsel %vm1220_vm4, %v1198_v38, %v1238_v16  ;;  %v938_v50 = vrot.slane %v937_v29, 4  ;;  %v952_v57 = vrot.slane %v951_v44, 4 }
 0x184   :  { %v945_v24 = vrot.slane %v944_v47, 4  ;;  %v959_v60 = vrot.slane %v958_v48, 4  ;;  %v620_v31 = vadd.f32 %v2152_v6, %v2056_v51  ;;  %v733_v49 = vadd.f32 %v2154_v40, %v2058_v52 }
 0x185   :  { %v939_v27 = vadd.f32 %v938_v50, %v937_v29  ;;  %v953_v17 = vadd.f32 %v952_v57, %v951_v44  ;;  %v622_v32 = vadd.f32 %v2160_v9, %v2060_v53  ;;  %v735_v15 = vadd.f32 %v2162_v10, %v2062_v54 }
 0x186   :  { %v946_v16 = vadd.f32 %v945_v24, %v944_v47  ;;  %v960_v58 = vadd.f32 %v959_v60, %v958_v48  ;;  %v801_v3 = vmax.f32 %v620_v31, 0.0  ;;  %v803_v4 = vmax.f32 %v733_v49, 0.0 }
 0x187   :  { %v940_v1 = vrot.slane %v939_v27, 2  ;;  %v954_v2 = vrot.slane %v953_v17, 2  ;;  %v802_v33 = vmax.f32 %v622_v32, 0.0  ;;  %v804_v45 = vmax.f32 %v735_v15, 0.0 }
 0x188   :  { %v947_v6 = vrot.slane %v946_v16, 2  ;;  %v961_v46 = vrot.slane %v960_v58, 2  ;;  %v624_v40 = vadd.f32 %v2168_v19, %v2056_v51  ;;  %v737_v9 = vadd.f32 %v2170_v20, %v2058_v52 }
 0x189   :  { %v941_v34 = vadd.f32 %v940_v1, %v939_v27  ;;  %v955_v18 = vadd.f32 %v954_v2, %v953_v17  ;;  %v626_v10 = vadd.f32 %v2172_v11, %v2060_v53  ;;  %v739_v37 = vadd.f32 %v2174_v12, %v2062_v54 }
 0x18a   :  { %v948_v28 = vadd.f32 %v947_v6, %v946_v16  ;;  %v962_v61 = vadd.f32 %v961_v46, %v960_v58  ;;  %v805_v43 = vmax.f32 %v624_v40, 0.0  ;;  %v807_v38 = vmax.f32 %v737_v9, 0.0 }
 0x18b   :  { %v942_v29 = vrot.slane %v941_v34, 1  ;;  %v956_v44 = vrot.slane %v955_v18, 1  ;;  %v806_v47 = vmax.f32 %v626_v10, 0.0  ;;  %v808_v48 = vmax.f32 %v739_v37, 0.0 }
 0x18c   :  { %v949_v19 = vrot.slane %v948_v28, 1  ;;  %v963_v50 = vrot.slane %v962_v61, 1  ;;  %v965_v57 = vadd.f32 %v805_v43, %v801_v3  ;;  %v979_v20 = vadd.f32 %v807_v38, %v803_v4 }
 0x18d   :  { %v943_v24 = vadd.f32 %v942_v29, %v941_v34  ;;  %v957_v60 = vadd.f32 %v956_v44, %v955_v18  ;;  %v972_v31 = vadd.f32 %v806_v47, %v802_v33  ;;  %v986_v49 = vadd.f32 %v808_v48, %v804_v45 }
 0x18e   :  { %v950_v11 = vadd.f32 %v949_v19, %v948_v28  ;;  %v964_v27 = vadd.f32 %v963_v50, %v962_v61  ;;  %v966_v17 = vrot.slane %v965_v57, 4  ;;  %v980_v12 = vrot.slane %v979_v20, 4 }
 0x18f   :  { %v1065_v32 = vpack.c.bf16 %v943_v24, %v943_v24  ;;  %v1067_v15 = vpack.c.bf16 %v957_v60, %v957_v60  ;;  %v973_v16 = vrot.slane %v972_v31, 4  ;;  %v987_v58 = vrot.slane %v986_v49, 4 }
 0x190   :  { %v1066_v1 = vpack.c.bf16 %v950_v11, %v950_v11  ;;  %v1068_v2 = vpack.c.bf16 %v964_v27, %v964_v27  ;;  %v967_v6 = vadd.f32 %v966_v17, %v965_v57  ;;  %v981_v46 = vadd.f32 %v980_v12, %v979_v20 }
 0x191   :  { %v1200_v40 = vunpack.c.l.b16 %v1065_v32  ;;  %v1202_v9 = vunpack.c.l.b16 %v1067_v15  ;;  %v974_v3 = vadd.f32 %v973_v16, %v972_v31  ;;  %v988_v4 = vadd.f32 %v987_v58, %v986_v49 }
 0x192   :  { %v2262_v34 = vunpack.c.l.b16 %v1066_v1  ;;  %v2264_v33 = vunpack.c.l.b16 %v1068_v2  ;;  %v968_v45 = vrot.slane %v967_v6, 2  ;;  %v982_v18 = vrot.slane %v981_v46, 2 }
 0x193   :  { %v2268_v10 = vsel %vm1222_vm5, %v1200_v40, %v2241_v41  ;;  %v2272_v37 = vsel %vm1222_vm5, %v1202_v9, %v2244_v42  ;;  %v975_v28 = vrot.slane %v974_v3, 2  ;;  %v989_v61 = vrot.slane %v988_v4, 2 }
 0x194   :  { %v969_v43 = vadd.f32 %v968_v45, %v967_v6  ;;  %v983_v38 = vadd.f32 %v982_v18, %v981_v46  ;;  %v630_v29 = vadd.f32 %v2176_v36, %v2056_v51  ;;  %v743_v44 = vadd.f32 %v2178_v0, %v2058_v52 }
 0x195   :  { %v976_v47 = vadd.f32 %v975_v28, %v974_v3  ;;  %v990_v48 = vadd.f32 %v989_v61, %v988_v4  ;;  %v632_v41 = vadd.f32 %v2180_v7, %v2060_v53  ;;  %v745_v19 = vadd.f32 %v2182_v5, %v2062_v54 }
 0x196   :  { %v970_v42 = vrot.slane %v969_v43, 1  ;;  %v984_v50 = vrot.slane %v983_v38, 1  ;;  %v809_v57 = vmax.f32 %v630_v29, 0.0  ;;  %v811_v20 = vmax.f32 %v743_v44, 0.0 }
 0x197   :  { %v977_v24 = vrot.slane %v976_v47, 1  ;;  %v991_v60 = vrot.slane %v990_v48, 1  ;;  %v810_v31 = vmax.f32 %v632_v41, 0.0  ;;  %v812_v49 = vmax.f32 %v745_v19, 0.0 }
 0x198   :  { %v971_v36 = vadd.f32 %v970_v42, %v969_v43  ;;  %v985_v11 = vadd.f32 %v984_v50, %v983_v38  ;;  %v634_v0 = vadd.f32 %v2184_v13, %v2056_v51  ;;  %v747_v27 = vadd.f32 %v2186_v14, %v2058_v52 }
 0x199   :  { %v978_v7 = vadd.f32 %v977_v24, %v976_v47  ;;  %v992_v17 = vadd.f32 %v991_v60, %v990_v48  ;;  %v636_v5 = vadd.f32 %v2192_v22, %v2060_v53  ;;  %v749_v12 = vadd.f32 %v2194_v56, %v2062_v54 }
 0x19a   :  { %v1069_v32 = vpack.c.bf16 %v971_v36, %v971_v36  ;;  %v1071_v15 = vpack.c.bf16 %v985_v11, %v985_v11  ;;  %v813_v16 = vmax.f32 %v634_v0, 0.0  ;;  %v815_v58 = vmax.f32 %v747_v27, 0.0 }
 0x19b   :  { %v1070_v1 = vpack.c.bf16 %v978_v7, %v978_v7  ;;  %v1072_v2 = vpack.c.bf16 %v992_v17, %v992_v17  ;;  %v814_v6 = vmax.f32 %v636_v5, 0.0  ;;  %v816_v46 = vmax.f32 %v749_v12, 0.0 }
 0x19c   :  { %v2290_v13 = vunpack.c.l.b16 %v1069_v32  ;;  %v2292_v40 = vunpack.c.l.b16 %v1071_v15  ;;  %v993_v14 = vadd.f32 %v813_v16, %v809_v57  ;;  %v1007_v9 = vadd.f32 %v815_v58, %v811_v20 }
 0x19d   :  { %v2294_v3 = vunpack.c.l.b16 %v1070_v1  ;;  %v2296_v22 = vunpack.c.l.b16 %v1072_v2  ;;  %v1000_v4 = vadd.f32 %v814_v6, %v810_v31  ;;  %v1014_v56 = vadd.f32 %v816_v46, %v812_v49 }
 0x19e   :  { %v994_v45 = vrot.slane %v993_v14, 4  ;;  %v1008_v18 = vrot.slane %v1007_v9, 4  ;;  %v640_v28 = vadd.f32 %v2212_v23, %v2056_v51  ;;  %v753_v61 = vadd.f32 %v2214_v59, %v2058_v52 }
 0x19f   :  { %v1001_v43 = vrot.slane %v1000_v4, 4  ;;  %v1015_v38 = vrot.slane %v1014_v56, 4  ;;  %v642_v29 = vadd.f32 %v2220_v35, %v2060_v53  ;;  %v755_v44 = vadd.f32 %v2222_v63, %v2062_v54 }
 0x1a0   :  { %v995_v47 = vadd.f32 %v994_v45, %v993_v14  ;;  %v1009_v48 = vadd.f32 %v1008_v18, %v1007_v9  ;;  %v817_v41 = vmax.f32 %v640_v28, 0.0  ;;  %v819_v19 = vmax.f32 %v753_v61, 0.0 }
 0x1a1   :  { %v1002_v42 = vadd.f32 %v1001_v43, %v1000_v4  ;;  %v1016_v50 = vadd.f32 %v1015_v38, %v1014_v56  ;;  %v818_v57 = vmax.f32 %v642_v29, 0.0  ;;  %v820_v20 = vmax.f32 %v755_v44, 0.0 }
 0x1a2   :  { %v996_v23 = vrot.slane %v995_v47, 2  ;;  %v1010_v24 = vrot.slane %v1009_v48, 2  ;;  %v644_v59 = vadd.f32 %v2228_v39, %v2056_v51  ;;  %v757_v60 = vadd.f32 %v2230_v8, %v2058_v52 }
 0x1a3   :  { %v1003_v35 = vrot.slane %v1002_v42, 2  ;;  %v1017_v31 = vrot.slane %v1016_v50, 2  ;;  %v646_v63 = vadd.f32 %v2232_v55, %v2060_v53  ;;  %v759_v49 = vadd.f32 %v2234_v21, %v2062_v54 }
 0x1a4   :  { %v997_v36 = vadd.f32 %v996_v23, %v995_v47  ;;  %v1011_v11 = vadd.f32 %v1010_v24, %v1009_v48  ;;  %v821_v0 = vmax.f32 %v644_v59, 0.0  ;;  %v823_v27 = vmax.f32 %v757_v60, 0.0 }
 0x1a5   :  { %v1004_v7 = vadd.f32 %v1003_v35, %v1002_v42  ;;  %v1018_v17 = vadd.f32 %v1017_v31, %v1016_v50  ;;  %v822_v5 = vmax.f32 %v646_v63, 0.0  ;;  %v824_v12 = vmax.f32 %v759_v49, 0.0 }
 0x1a6   :  { %v998_v51 = vrot.slane %v997_v36, 1  ;;  %v1012_v39 = vrot.slane %v1011_v11, 1  ;;  %v1021_v52 = vadd.f32 %v821_v0, %v817_v41  ;;  %v1035_v8 = vadd.f32 %v823_v27, %v819_v19 }
 0x1a7   :  { %v1005_v32 = vrot.slane %v1004_v7, 1  ;;  %v1019_v15 = vrot.slane %v1018_v17, 1  ;;  %v1028_v53 = vadd.f32 %v822_v5, %v818_v57  ;;  %v1042_v55 = vadd.f32 %v824_v12, %v820_v20 }
 0x1a8   :  { %v999_v16 = vadd.f32 %v998_v51, %v997_v36  ;;  %v1013_v54 = vadd.f32 %v1012_v39, %v1011_v11  ;;  %v1022_v21 = vrot.slane %v1021_v52, 4  ;;  %v1036_v58 = vrot.slane %v1035_v8, 4 }
 0x1a9   :  { %v1006_v1 = vadd.f32 %v1005_v32, %v1004_v7  ;;  %v1020_v2 = vadd.f32 %v1019_v15, %v1018_v17  ;;  %v1029_v6 = vrot.slane %v1028_v53, 4  ;;  %v1043_v46 = vrot.slane %v1042_v55, 4 }
 0x1aa   :  { %v1073_v14 = vpack.c.bf16 %v999_v16, %v999_v16  ;;  %v1075_v9 = vpack.c.bf16 %v1013_v54, %v1013_v54  ;;  %v1023_v4 = vadd.f32 %v1022_v21, %v1021_v52  ;;  %v1037_v56 = vadd.f32 %v1036_v58, %v1035_v8  ;;  %v1638_v21 = vld [vmem:[%s2357_s4] ss:$0 sm:$0xff] }
 0x1ab   :  { %v1074_v45 = vpack.c.bf16 %v1006_v1, %v1006_v1  ;;  %v1076_v18 = vpack.c.bf16 %v1020_v2, %v1020_v2  ;;  %v1030_v28 = vadd.f32 %v1029_v6, %v1028_v53  ;;  %v1044_v61 = vadd.f32 %v1043_v46, %v1042_v55 }
 0x1ac   :  { %v1208_v43 = vunpack.c.l.b16 %v1073_v14  ;;  %v1210_v38 = vunpack.c.l.b16 %v1075_v9  ;;  %v1024_v29 = vrot.slane %v1023_v4, 2  ;;  %v1038_v44 = vrot.slane %v1037_v56, 2 }
 0x1ad   :  { %v1209_v47 = vunpack.c.l.b16 %v1074_v45  ;;  %v1211_v48 = vunpack.c.l.b16 %v1076_v18  ;;  %v1031_v41 = vrot.slane %v1030_v28, 2  ;;  %v1045_v19 = vrot.slane %v1044_v61, 2 }
 0x1ae   :  { %v1025_v42 = vadd.f32 %v1024_v29, %v1023_v4  ;;  %v1039_v50 = vadd.f32 %v1038_v44, %v1037_v56  ;;  %v1232_v57 = vsel %vm1220_vm4, %v2236_v30, %v2198_v25  ;;  %v1246_v20 = vsel %vm1220_vm4, %v2238_v62, %v2202_v26 }
 0x1af   :  { %v1032_v23 = vadd.f32 %v1031_v41, %v1030_v28  ;;  %v1046_v24 = vadd.f32 %v1045_v19, %v1044_v61  ;;  %v1233_v59 = vsel %vm1222_vm5, %v2262_v34, %v1232_v57  ;;  %v1247_v60 = vsel %vm1222_vm5, %v2264_v33, %v1246_v20 }
 0x1b0   :  { %v1026_v35 = vrot.slane %v1025_v42, 1  ;;  %v1040_v31 = vrot.slane %v1039_v50, 1  ;;  %v1234_v63 = vsel %vm1224_vm6, %v2294_v3, %v1233_v59  ;;  %v1248_v25 = vsel %vm1224_vm6, %v2296_v22, %v1247_v60 }
 0x1b1   :  { %v1033_v30 = vrot.slane %v1032_v23, 1  ;;  %v1047_v49 = vrot.slane %v1046_v24, 1  ;;  %v1235_v26 = vsel %vm1226_vm7, %v1209_v47, %v1234_v63  ;;  %v1249_v62 = vsel %vm1226_vm7, %v1211_v48, %v1248_v25 }
 0x1b2   :  { %v1027_v36 = vadd.f32 %v1026_v35, %v1025_v42  ;;  %v1041_v11 = vadd.f32 %v1040_v31, %v1039_v50  ;;  %v1225_v34 = vsel %vm1224_vm6, %v2290_v13, %v2268_v10  ;;  %v1241_v33 = vsel %vm1224_vm6, %v2292_v40, %v2272_v37 }
 0x1b3   :  { %v1034_v3 = vadd.f32 %v1033_v30, %v1032_v23  ;;  %v1048_v0 = vadd.f32 %v1047_v49, %v1046_v24  ;;  %v1227_v22 = vsel %vm1226_vm7, %v1208_v43, %v1225_v34  ;;  %v1242_v27 = vsel %vm1226_vm7, %v1210_v38, %v1241_v33 }
 0x1b4   :  { %v1077_v7 = vpack.c.bf16 %v1027_v36, %v1027_v36  ;;  %v1079_v17 = vpack.c.bf16 %v1041_v11, %v1041_v11 }
 0x1b5   :  { %v1078_v5 = vpack.c.bf16 %v1034_v3, %v1034_v3  ;;  %v1080_v12 = vpack.c.bf16 %v1048_v0, %v1048_v0 }
 0x1b6   :  { %v1212_v51 = vunpack.c.l.b16 %v1077_v7  ;;  %v1214_v39 = vunpack.c.l.b16 %v1079_v17 }
 0x1b7   :  { %v1213_v52 = vunpack.c.l.b16 %v1078_v5  ;;  %v1215_v8 = vunpack.c.l.b16 %v1080_v12 }
 0x1b8   :  { %v1229_v10 = vsel %vm1228_vm8, %v1212_v51, %v1227_v22  ;;  %v1243_v13 = vsel %vm1228_vm8, %v1214_v39, %v1242_v27 }
 0x1b9   :  { %v1236_v32 = vsel %vm1228_vm8, %v1213_v52, %v1235_v26  ;;  %v1250_v15 = vsel %vm1228_vm8, %v1215_v8, %v1249_v62  ;;  %v1251_v53 = vpack.c.b16 %v1229_v10, %v1229_v10  ;;  %v1253_v55 = vpack.c.b16 %v1243_v13, %v1243_v13 }
 0x1ba   :  { %v1252_v37 = vpack.c.b16 %v1236_v32, %v1236_v32  ;;  %v1254_v40 = vpack.c.b16 %v1250_v15, %v1250_v15 }
 0x1bc   :  { %1483 = vmatprep.mubr.bf16.mxu0 %v1252_v37  ;;  %1523 = vmatprep.mubr.bf16.mxu1 %v1254_v40 }
 0x1bd   :  { %1484 = vmatmul.mubr.bf16.vlgmr.msra.gmra.mrb[32].mxu0 %v1251_v53  ;;  %1524 = vmatmul.mubr.bf16.vlgmr.msra.gmra.mrb[32].mxu1 %v1253_v55 }
 0x290   :  { %v1687_v16 = vpop.f32.mrb[32].mxu0  ;;  %v1709_v54 = vpop.f32.mrb[32].mxu1 }
 0x291   :  { %v1688_v58 = vpop.f32.mrb[33].mxu0  ;;  %v1710_v1 = vpop.f32.mrb[33].mxu1 }
 0x292   :  { %v1689_v2 = vadd.f32 %v1688_v58, %v1687_v16  ;;  %v1711_v6 = vadd.f32 %v1710_v1, %v1709_v54  ;;  %v1690_v46 = vpop.f32.mrb[34].mxu0  ;;  %v1712_v14 = vpop.f32.mrb[34].mxu1 }
 0x293   :  { %v1691_v9 = vpop.f32.mrb[35].mxu0  ;;  %v1713_v4 = vpop.f32.mrb[35].mxu1 }
 0x294   :  { %v1486_v56 = vadd.f32 %v1689_v2, %v1638_v21 }
 0x296   :  { %v1526_v45 = vadd.f32 %v1711_v6, %v1486_v56 }
 0x298   :  { %1531 = vst [vmem:[#allocation8] sm:$0xff] %v1526_v45 }
 0x299   :  { %1940 = shalt.err (!%p1937_p0)
}
 0x29a   :  { %s1941_s14 = scalar_lea.hbm %s2358_s5, 128 }
 0x29b   :  { %p1942_p1 = scmp.ne.s32.totalorder %s2358_s5, %s1941_s14  ;;  %p1945_p2 = scmp.lt.u32.totalorder %s1941_s14, %s2358_s5 }
 0x29d   :  { %p1947_p3 = pnand %p1945_p2, %p1942_p1 }
 0x29f   :  { %1950 = shalt.err (!%p1947_p3)
}
 0x2a0   :  { %1541 = dma.vmem_to_hbm [thread:$0]  %s1539_s11, 128, %s2358_s5, [#allocation4]  }
 0x2a1   :  { %1955 = dma.done.wait [#allocation4], 128  }
 0x2a2   :  { %1956 = vsyncadd [#allocation4], 4294967168 }
 0x2a3   :  { %1545 = vsyncpa [#allocation3], 1 }
 0x2a4   :  { %1546 = vsyncpa [#allocation6], 1 }
 0x2a5   :  { %1547 = vsyncpa [#allocation4], 1 }

</bundles_post_ra>
